<compile_context>
chip_gen: v5e
topology: v5e:2x2
jax: 0.10.0
libtpu: 0.0.40
codegen_flags: <defaults>
</compile_context>

<pallas_src>
import jax
import jax.numpy as jnp
from jax.experimental import pallas as pl
from jax.experimental.pallas import tpu as pltpu


def _conv1x1_kernel(w_ref, x_ref, o_ref):
    """One lane-dense tile of the 1x1 conv as a single MXU dot.

    w_ref: VMEM (C_out, C_in) f32 weight (resident; constant index_map)
    x_ref: VMEM (C_in, T)     input tile  (N dim squeezed, T = H*W tile)
    o_ref: VMEM (C_out, T)    output tile
    """
    o_ref[...] = jnp.dot(
        w_ref[...],
        x_ref[...].astype(jnp.float32),
        preferred_element_type=jnp.float32,
        precision=jax.lax.Precision.HIGHEST,
    ).astype(o_ref.dtype)


def _round_up(x, m):
    return (x + m - 1) // m * m


def _pick_vmem_limit_bytes():
    """Generation-aware scoped-VMEM limit (v7x only has 64 MiB per TC)."""
    try:
        cap = pltpu.get_tpu_info().vmem_capacity_bytes
    except Exception:  # noqa: BLE001 -- unknown chip: stay conservative
        cap = 0
    if cap >= 96 * 1024 * 1024:      # v5e / v6e: 128 MiB physical
        return 64 * 1024 * 1024
    if cap >= 48 * 1024 * 1024:      # v7x: 64 MiB per TC
        return 44 * 1024 * 1024
    return 32 * 1024 * 1024          # unknown: scoped default


def _choose_tile_hw(hw, c_in, c_out, itemsize, vmem_limit_bytes, batch):
    """Largest lane-dense (multiple-of-128) H*W tile whose DOUBLE-BUFFERED
    input+output blocks fit comfortably in the scoped VMEM limit, while
    leaving >= 2 parallel grid steps for megacore sharding."""
    bytes_per_col = (c_in + c_out) * itemsize
    usable = int(vmem_limit_bytes * 0.75)          # headroom: weight + scratch
    max_tile = usable // (2 * bytes_per_col)       # explicit x2 double buffer
    max_tile = max((max_tile // 128) * 128, 128)
    tile = min(max_tile, _round_up(hw, 128))
    # v7x has 2 TensorCores: make sure the grid has >= 2 parallel steps.
    while batch * pl.cdiv(_round_up(hw, 128), tile) < 2 and tile > 128:
        tile = max(((tile // 2) // 128) * 128, 128)
    return tile


def net_lin_layer(x_nchw, weight_oi11):
    """Forward pass of NetLinLayer (use_dropout=False / eval mode).

    x_nchw:      (N, C_in, H, W)     float32 or bfloat16
    weight_oi11: (C_out, C_in, 1, 1) PyTorch Conv2d weight layout, bias=False
    returns:     (N, C_out, H, W)    same dtype as x
    """
    N, C_in, H, W = x_nchw.shape
    C_out = weight_oi11.shape[0]
    HW = H * W

    # Free (transpose-less) reshapes: keep NCHW, put flattened H*W on lanes.
    x_flat = x_nchw.reshape(N, C_in, HW)
    w_mat = weight_oi11.reshape(C_out, C_in).astype(jnp.float32)

    itemsize = jnp.dtype(x_nchw.dtype).itemsize
    vmem_limit = _pick_vmem_limit_bytes()
    tile_hw = _choose_tile_hw(HW, C_in, C_out, itemsize, vmem_limit, N)

    # Pad ragged H*W up to a whole number of lane-dense tiles (masked copy of
    # the tail in HBM beats a whole-slab fallback that can exceed VMEM).
    n_tiles = pl.cdiv(HW, tile_hw)
    HW_pad = n_tiles * tile_hw
    if HW_pad != HW:
        x_flat = jnp.pad(x_flat, ((0, 0), (0, 0), (0, HW_pad - HW)))

    grid = (N, n_tiles)
    flops = 2 * N * C_out * C_in * HW_pad
    bytes_accessed = (N * C_in * HW_pad + N * C_out * HW_pad) * itemsize \
        + C_out * C_in * 4

    out_flat = pl.pallas_call(
        _conv1x1_kernel,
        out_shape=jax.ShapeDtypeStruct((N, C_out, HW_pad), x_nchw.dtype),
        grid_spec=pltpu.PrefetchScalarGridSpec(
            num_scalar_prefetch=0,
            grid=grid,
            in_specs=[
                # Tiny weight: whole array resident in VMEM (constant index).
                pl.BlockSpec((C_out, C_in), lambda n, t: (0, 0)),
                # Input tile: (C_in, tile_hw) after squeezing N; lane axis=H*W.
                pl.BlockSpec((pl.Squeezed(), C_in, tile_hw),
                             lambda n, t: (n, 0, t)),
            ],
            # Lane-dense output tile (last dim is the H*W tile, not C_out).
            out_specs=pl.BlockSpec((pl.Squeezed(), C_out, tile_hw),
                                   lambda n, t: (n, 0, t)),
        ),
        compiler_params=pltpu.CompilerParams(
            dimension_semantics=("parallel", "parallel"),
            vmem_limit_bytes=vmem_limit,
        ),
        cost_estimate=pl.CostEstimate(
            flops=flops, transcendentals=0, bytes_accessed=bytes_accessed
        ),
    )(w_mat, x_flat)

    if HW_pad != HW:
        out_flat = out_flat[:, :, :HW]
    return out_flat.reshape(N, C_out, H, W)


if __name__ == "__main__":
    key = jax.random.PRNGKey(0)
    kx, kw = jax.random.split(key)

    # Small shapes implied by the module: 1x1 conv over NCHW feature maps.
    N, C_in, H, W = 2, 4, 16, 16
    C_out = 1

    x = jax.random.normal(kx, (N, C_in, H, W), dtype=jnp.float32)
    # PyTorch Conv2d weight layout (C_out, C_in, 1, 1), bias=False.
    weight = jax.random.normal(kw, (C_out, C_in, 1, 1), dtype=jnp.float32) * 0.1

    out = net_lin_layer(x, weight)
    out = jax.block_until_ready(out)

    # Cross-check against plain-JAX reference (1x1 conv == channel contraction).
    ref = jnp.einsum(
        "nchw,oc->nohw", x, weight[:, :, 0, 0],
        precision=jax.lax.Precision.HIGHEST,
    )
    assert out.shape == (N, C_out, H, W)
    assert jnp.allclose(out, ref, atol=1e-5, rtol=1e-5)

    print("KERNEL_OK")
</pallas_src>

<mosaic_0001>
module attributes {stable_mosaic.version = 11 : i64} {
  func.func @_conv1x1_kernel(%arg0: i32, %arg1: i32, %arg2: memref<1x4xf32, #tpu.memory_space<vmem>>, %arg3: memref<1x4x256xf32, #tpu.memory_space<vmem>>, %arg4: memref<1x1x256xf32, #tpu.memory_space<vmem>>) attributes {dimension_semantics = [#tpu.dimension_semantics<parallel>, #tpu.dimension_semantics<parallel>], iteration_bounds = array<i64: 2, 1>, scalar_prefetch = 0 : i64, scratch_operands = 0 : i64, tpu.core_type = #tpu.core_type<tc>, window_params = [{pipeline_mode = #tpu.pipeline_mode<synchronous>, transform_indices = @transform_0, window_bounds = array<i64: 1, 4>}, {transform_indices = @transform_1, window_bounds = array<i64: 1, 4, 256>}, {transform_indices = @transform_2, window_bounds = array<i64: 1, 1, 256>}]} {
    %c0 = arith.constant 0 : index
    %c0_0 = arith.constant 0 : index
    %0 = vector.load %arg2[%c0, %c0_0] : memref<1x4xf32, #tpu.memory_space<vmem>>, vector<1x4xf32>
    %c0_1 = arith.constant 0 : index
    %c0_2 = arith.constant 0 : index
    %c0_3 = arith.constant 0 : index
    %1 = vector.load %arg3[%c0_1, %c0_2, %c0_3] : memref<1x4x256xf32, #tpu.memory_space<vmem>>, vector<1x4x256xf32>
    %2 = vector.shape_cast %1 : vector<1x4x256xf32> to vector<4x256xf32>
    %cst = arith.constant dense<0.000000e+00> : vector<1x256xf32>
    %3 = tpu.matmul %0, %2, %cst {dimension_numbers = #tpu.dot_dimension_numbers<[1], [0], [0], [1], [0, 0, 1, 1], [], []>, precision = #tpu.contract_precision<fp32>} : vector<1x4xf32>, vector<4x256xf32>, vector<1x256xf32> -> vector<1x256xf32>
    %c0_4 = arith.constant 0 : index
    %c0_5 = arith.constant 0 : index
    %c0_6 = arith.constant 0 : index
    %4 = vector.load %arg4[%c0_4, %c0_5, %c0_6] : memref<1x1x256xf32, #tpu.memory_space<vmem>>, vector<1x1x256xf32>
    %5 = vector.shape_cast %4 : vector<1x1x256xf32> to vector<1x256xf32>
    %6 = vector.shape_cast %3 : vector<1x256xf32> to vector<1x1x256xf32>
    tpu.vector_store %arg4[%c0_4, %c0_5, %c0_6], %6 {strides = array<i32>} : memref<1x1x256xf32, #tpu.memory_space<vmem>>, vector<1x1x256xf32>,
    return
  }
  func.func @transform_0(%arg0: i32, %arg1: i32) -> (i32, i32) {
    %c0_i32 = arith.constant 0 : i32
    %c0_i32_0 = arith.constant 0 : i32
    %c0_i32_1 = arith.constant 0 : i32
    return %c0_i32, %c0_i32_0 : i32, i32
  }
  func.func @transform_1(%arg0: i32, %arg1: i32) -> (i32, i32, i32) {
    %c0_i32 = arith.constant 0 : i32
    %c0_i32_0 = arith.constant 0 : i32
    return %arg0, %c0_i32, %arg1 : i32, i32, i32
  }
  func.func @transform_2(%arg0: i32, %arg1: i32) -> (i32, i32, i32) {
    %c0_i32 = arith.constant 0 : i32
    %c0_i32_0 = arith.constant 0 : i32
    return %arg0, %c0_i32, %arg1 : i32, i32, i32
  }
}

</mosaic_0001>

<bundles_post_ra>
// kernel: tpu_custom_call.1
= control target key start
LH: loop header
LB: loop body
LE: loop exit
PB: predicated region body
PF: predicated region fallthrough
CT: control target
= control target key end

     0   :  { %7 = vsyncpa [#allocation3], 0  ;;  %s1032_s0 = inlined_call_operand.hbm [shape: f32[1,4], index: 0, kind: input, shape index: {}]   ;;  %s1033_s1 = inlined_call_operand.hbm [shape: f32[2,4,256], index: 1, kind: input, shape index: {}]   ;;  %s1034_s2 = inlined_call_operand.hbm [shape: f32[2,1,256], index: 2, kind: output, shape index: {}]  }
   0x1   :  { %8 = vsyncpa [#allocation6], 0 }
   0x2   :  { %10 = vsyncpa [#allocation6 + $0x1], 0 }
   0x3   :  { %11 = vsyncpa [#allocation4], 0 }
   0x4   :  { %13 = vsyncpa [#allocation4 + $0x1], 0  ;;  %s882_s9 = smov 0   ;;  %s884_s10 = smov 0  }
   0x5   :  { %s886_s11 = smov 0   ;;  %s888_s12 = smov 0  }
   0x6   :  { %s890_s13 = smov 0   ;;  %s892_s14 = smov 0  }
   0x7 LB: > { %s628_s15 = sadd.s32 4294967295, %s864_s14   ;;  %s629_s16 = sadd.s32 4294967294, %s864_s14   ;;  %s864_s14 = sphi %s892_s14, %s19_s14   ;;  %s860_s13 = sphi %s890_s13, %s1046_s13   ;;  %s856_s12 = sphi %s888_s12, %s1045_s12   ;;  %s852_s11 = sphi %s886_s11, %s1044_s11   ;;  %s848_s10 = sphi %s884_s10, %s1043_s10   ;;  %s844_s9 = sphi %s882_s9, %s1042_s9  }
   0x8   : > { %p74_p0 = scmp.ne.s32.totalorder %s848_s10, %s844_s9  ;;  %p916_p1 = scmp.eq.s32.totalorder %s628_s15, 0 }
   0x9   : > { %p920_p2 = scmp.eq.s32.totalorder %s628_s15, 1  ;;  %p106_p3 = scmp.eq.s32.totalorder %s629_s16, 1 }
   0xa   : > { %p926_p4 = por %p916_p1, %p74_p0  ;;  %p630_p5 = scmp.ge.s32.totalorder %s864_s14, 1 }
   0xb   : > { %p931_p6 = por %p106_p3, %p74_p0  ;;  %p113_p7 = scmp.lt.s32.totalorder %s864_s14, 3 }
   0xc   : > { %s125_s23 = sshll.u32 %s1032_s0, 4  ;;  %p632_p9 = scmp.ge.s32.totalorder %s864_s14, 2  ;;  %s126_s23 = int_to_ptr.hbm [resolvable:$true] %s125_s23 }
   0xd   : > { %p939_p8 = pnand %p630_p5, %p113_p7  ;;  %s866_s25 = smov [#allocation2]  }
   0xe   : > { %s127_s26 = sshll.u32 %s866_s25, 4  ;;  %s31_s27 = sadd.s32 1, %s860_s13  ;;  %s128_s26 = int_to_ptr.vmem [resolvable:$true] %s127_s26 }
   0xf   : > { %p653_p10 = pneg %p939_p8  ;;  %p33_p12 = scmp.ge.s32.totalorder %s31_s27, 2 }
  0x10   : > { %s61_s28 = sadd.s32 1, %s852_s11  ;;  %p68_p13 = scmp.ne.s32.totalorder %s852_s11, %s848_s10 }
  0x11   : > { %p654_p11 = pnand %p653_p10, %p916_p1  ;;  %p69_p0 = scmp.eq.s32.totalorder %s864_s14, 0 }
  0x12   : > { %s1048_s27 = smov (%p33_p12, %s31_s27), 0  ;;  %p961_p5 = por %p920_p2, %p68_p13 }
  0x13   : > { %656 = dma.hbm_to_vmem [thread:$0]  (!%p654_p11), %s126_s23, 16, %s128_s26, [#allocation3]  }
  0x14   : > { %p955_p3 = por %p69_p0, %p68_p13  ;;  %s56_s3 = ssub.s32 %s860_s13, %s1048_s27 }
  0x15   : > { %p666_p7 = scmp.lt.s32.totalorder %s864_s14, 2  ;;  %p59_p10 = scmp.eq.s32.totalorder %s56_s3, 0 }
  0x16   : > { %s138_s4 = sand.u32 1, %s852_s11   ;;  %s644_s7 = sshll.u32 %s860_s13, 3 }
  0x17   : > { %s633_s5 = sshll.u32 %s138_s4, 3  ;;  %s149_s16 = scalar_lea.hbm %s1033_s1, %s644_s7 }
  0x18   : > { %s970_s6 = scalar_select %p59_p10, %s852_s11, %s61_s28  }
  0x19   : > { %s142_s21 = scalar_lea.vmem [#allocation5], %s633_s5  ;;  %s151_s18 = sshll.u32 %s149_s16, 4  ;;  %s152_s18 = int_to_ptr.hbm [resolvable:$true] %s151_s18 }
  0x1a   : > { %s153_s22 = sshll.u32 %s142_s21, 4  ;;  %p658_p2 = pnand %p666_p7, %p955_p3  ;;  %s154_s22 = int_to_ptr.vmem [resolvable:$true] %s153_s22 }
  0x1b   : > { %s139_s23 = scalar_lea.sflag [#allocation6], %s138_s4  ;;  %162 = sbr.rel (%p939_p8) target bundleno = 212 (0xd4), region = 28 }
  0x1c   : > { %660 = dma.hbm_to_vmem [thread:$0]  (!%p658_p2), %s152_s18, 128, %s154_s22, %s139_s23  }
  0x20   : > { %831 = dma.done.wait (%p916_p1), [#allocation3], 16  }
  0x21   : > { %833 = vsyncadd (%p916_p1), [#allocation3], 4294967280  ;;  %s985_s25 = sand.u32 1, %s848_s10  }
  0x22   : > { %s638_s26 = sshll.u32 %s985_s25, 3  ;;  %s170_s28 = scalar_lea.sflag [#allocation6], %s985_s25 }
  0x23   : > { %s173_s29 = scalar_lea.vmem [#allocation5], %s638_s26 }
  0x24   : > { %835 = dma.done.wait (%p926_p4), %s170_s28, 128  }
  0x25   : > { %837 = vsyncadd (%p926_p4), %s170_s28, 4294967168  ;;  %vm203_vm0 = vcmask 31744   ;;  %v198_v0 = vld [vmem:[%s173_s29] sm:$0xff]  ;;  %v197_v1 = vld [vmem:[#allocation2] sm:$0x1]  ;;  %vm207_vm1 = vcmask 1043456   ;;  %v510_v42 = vlaneseq }
  0x26   : > { %200 = vst [vmem:[#allocation1] ss:$2 sm:$0xff] %v198_v0  ;;  %v205_v2 = vsel %vm203_vm0, %v197_v1, 0  ;;  %s639_s17 = sshll.u32 %s985_s25, 1  ;;  %s641_s19 = sshll.u32 %s856_s12, 1  ;;  %vm507_vm2 = vcmask 1040384  }
  0x27   : > { %v229_v3 = vand.u32 4294901760, %v205_v2  ;;  %s528_s4 = scalar_lea.hbm %s1034_s2, %s641_s19  ;;  %s194_s5 = scalar_lea.vmem [#allocation7], %s639_s17  ;;  %vm512_vm3 = vcmp.lt.s32.totalorder %v510_v42, 256 }
  0x28   : > { %s530_s7 = sshll.u32 %s194_s5, 4  ;;  %s532_s8 = sshll.u32 %s528_s4, 4  ;;  %s531_s7 = int_to_ptr.vmem [resolvable:$true] %s530_s7  ;;  %s533_s8 = int_to_ptr.hbm [resolvable:$true] %s532_s8 }
  0x29   : > { %v230_v4 = vsub.f32 %v205_v2, %v229_v3  ;;  %s516_s12 = scalar_lea.sflag [#allocation4], %s985_s25  ;;  %s792_s15 = sshra.s32 %s533_s8, 4  ;;  %s793_s15 = int_to_ptr.hbm [resolvable:$true] %s792_s15 }
  0x2a   : > { %s794_s16 = scalar_lea.hbm %s793_s15, 2  ;;  %s798_s18 = scalar_lea.hbm %s1034_s2, 4 }
  0x2b   : > { %v231_v5 = vand.u32 4294901760, %v230_v4  ;;  %p795_p1 = scmp.ne.s32.totalorder %s793_s15, %s794_s16  ;;  %p799_p11 = scmp.lt.s32.totalorder %s793_s15, %s1034_s2 }
  0x2c   : > { %p800_p12 = scmp.lt.s32.totalorder %s798_s18, %s794_s16 }
  0x2d   : > { %v201_v6 = vld.sshfl [vmem:[#allocation1] sm:$0xff pattern:$0x75316420]  ;;  %v202_v7 = vld.sshfl [vmem:[#allocation1 + $0x8] sm:$0xff pattern:$0x75316420]  ;;  %v232_v8 = vsub.f32 %v230_v4, %v231_v5  ;;  %p796_p4 = pnand %p795_p1, %p961_p5 }
  0x2e   : > { %v208_v9 = vsel %vm207_vm1, %v201_v6, 0  ;;  %v210_v10 = vsel %vm207_vm1, %v202_v7, 0  ;;  %p801_p13 = por %p800_p12, %p799_p11 }
  0x2f   : > { %v227_v11 = vand.u32 4294901760, %v208_v9  ;;  %v233_v12 = vand.u32 4294901760, %v232_v8  ;;  %v373_v13 = vand.u32 4294901760, %v210_v10  ;;  %p797_p8 = pneg %p796_p4 }
  0x31   : > { %v254_v14 = vsub.f32 %v208_v9, %v227_v11  ;;  %228 = vmatpush.msra.mxu0 %v227_v11  ;;  %304 = vmatpush.msra.mxu3 %v227_v11  ;;  %v400_v15 = vsub.f32 %v210_v10, %v373_v13  ;;  %p802_p0 = pnand %p801_p13, %p797_p8 }
  0x32   : > { %234 = vmatmul.f32.vlgmr.msra.gmra.mxu0 %v233_v12  ;;  %308 = vmatmul.f32.vlgmr.msra.gmra.mxu3 %v231_v5 }
  0x33   : > { %281 = vmatpush.msra.mxu2 %v254_v14  ;;  %v255_v16 = vand.u32 4294901760, %v254_v14  ;;  %v401_v17 = vand.u32 4294901760, %v400_v15 }
  0x34   : > { %284 = vmatmul.f32.vlgmr.msra.gmra.mxu2 %v230_v4 }
  0x35   : > { %374 = vmatpush.msrb.mxu2 %v373_v13  ;;  %v256_v18 = vsub.f32 %v254_v14, %v255_v16  ;;  %330 = vmatpush.msrb.mxu0 %v255_v16  ;;  %v402_v19 = vsub.f32 %v400_v15, %v401_v17 }
  0x37   : > { %476 = vmatpush.msra.mxu2 %v401_v17  ;;  %427 = vmatpush.msra.mxu0 %v400_v15  ;;  %v257_v20 = vand.u32 4294901760, %v256_v18  ;;  %v403_v21 = vand.u32 4294901760, %v402_v19 }
  0x39   : > { %258 = vmatpush.msra.mxu1 %v257_v20  ;;  %404 = vmatpush.msrb.mxu3 %v403_v21 }
  0x3a   : > { %260 = vmatmul.f32.vlgmr.msra.gmra.mxu1 %v229_v3  ;;  %332 = vmatmul.f32.vlgmr.msrb.gmra.mxu0 %v229_v3 }
  0x3b   : > { %352 = vmatpush.msrb.mxu1 %v227_v11  ;;  %406 = vmatmul.f32.vlgmr.msrb.gmra.mxu3 %v229_v3 }
  0x3c   : > { %380 = vmatmul.f32.vlgmr.msrb.gmra.mxu2 %v233_v12  ;;  %498 = vmatpush.msra.mxu3 %v373_v13 }
  0x3d   : > { %450 = vmatpush.msra.mxu1 %v373_v13 }
  0x42   : > { %354 = vmatmul.f32.vlgmr.msrb.gmra.mxu1 %v229_v3  ;;  %430 = vmatmul.f32.vlgmr.msra.gmra.mxu0 %v230_v4 }
  0x43   : > { %500 = vmatmul.f32.vlgmr.msra.gmra.mxu3 %v229_v3 }
  0x44   : > { %478 = vmatmul.f32.vlgmr.msra.gmra.mxu2 %v229_v3 }
  0x4a   : > { %454 = vmatmul.f32.vlgmr.msra.gmra.mxu1 %v231_v5 }
  0xaf   : > { %v235_v22 = vpop.f32.mrf.mxu0 }
  0xb5   : > { %v309_v23 = vpop.f32.mrf.mxu3 }
  0xb7   : > { %v261_v24 = vpop.f32.mrf.mxu1  ;;  %v285_v25 = vpop.f32.mrf.mxu2 }
  0xb8   : > { %v333_v26 = vpop.f32.mrf.mxu0  ;;  %v262_v27 = vadd.f32 %v261_v24, %v235_v22 }
  0xba   : > { %v286_v31 = vadd.f32 %v285_v25, %v262_v27 }
  0xbc   : > { %v310_v34 = vadd.f32 %v309_v23, %v286_v31 }
  0xbe   : > { %v407_v28 = vpop.f32.mrf.mxu3  ;;  %v334_v40 = vadd.f32 %v333_v26, %v310_v34 }
  0xbf   : > { %v355_v29 = vpop.f32.mrf.mxu1  ;;  %v381_v30 = vpop.f32.mrf.mxu2 }
  0xc0   : > { %v408_v32 = vadd.f32 %v407_v28, %v381_v30  ;;  %v431_v33 = vpop.f32.mrf.mxu0  ;;  %v356_v44 = vadd.f32 %v355_v29, %v334_v40 }
  0xc2   : > { %v432_v35 = vadd.f32 %v431_v33, %v408_v32 }
  0xc6   : > { %v501_v39 = vpop.f32.mrf.mxu3 }
  0xc7   : > { %v455_v36 = vpop.f32.mrf.mxu1  ;;  %v479_v37 = vpop.f32.mrf.mxu2 }
  0xc8   : > { %v456_v38 = vadd.f32 %v455_v36, %v432_v35 }
  0xca   : > { %v480_v41 = vadd.f32 %v479_v37, %v456_v38 }
  0xcc   : > { %v502_v43 = vadd.f32 %v501_v39, %v480_v41 }
  0xce   : > { %v506_v45 = vrot.slane %v502_v43, 7 }
  0xd0   : > { %v508_v46 = vsel %vm507_vm2, %v356_v44, %v506_v45 }
  0xd1   : > { %514 = vst.msk [vmem:[%s194_s5] sm:$0x3] %vm512_vm3, %v508_v46 }
  0xd2   : > { %805 = shalt.err (!%p802_p0)
}
  0xd3   : > { %651 = dma.vmem_to_hbm [thread:$0]  (%p961_p5), %s531_s7, 32, %s533_s8, %s516_s12  }
  0xd4 PF: > { %s544_s25 = sand.u32 1, %s844_s9   ;;  %p662_p3 = pnand %p632_p9, %p931_p6 }
  0xd5   : > { %s545_s28 = scalar_lea.sflag [#allocation4], %s544_s25 }
  0xd6   : > { %p663_p7 = pneg %p662_p3 }
  0xd8   : > { %839 = dma.done.wait (%p663_p7), %s545_s28, 32  }
  0xd9   : > { %841 = vsyncadd (%p663_p7), %s545_s28, 4294967264  ;;  %s19_s14 = sadd.s32 1, %s864_s14   ;;  %s1042_s9 = smov %s848_s10 }
  0xda   : > { %p16_p10 = scmp.ge.s32.totalorder %s19_s14, 4   ;;  %s1043_s10 = smov %s852_s11 }
  0xdb   : > { %s1044_s11 = smov %s970_s6  ;;  %s1045_s12 = smov %s860_s13 }
  0xdc   : > { %s1046_s13 = smov %s1048_s27  ;;  %18 = sbr.rel (!%p16_p10) target bundleno = 7 (0x7), region = 78 }
  0xe1   :  { %551 = vsyncpa [#allocation3], 1 }
  0xe2   :  { %553 = vsyncpa [#allocation3 + $0x1], 1 }
  0xe3   :  { %554 = vsyncpa [#allocation6], 1 }
  0xe4   :  { %556 = vsyncpa [#allocation6 + $0x1], 1 }
  0xe5   :  { %557 = vsyncpa [#allocation4], 1 }
  0xe6   :  { %559 = vsyncpa [#allocation4 + $0x1], 1 }

</bundles_post_ra>
